<compile_context>
chip_gen: v6e
topology: v6e:2x2x1
jax: 0.10.0
libtpu: 0.0.40
codegen_flags: <defaults>
</compile_context>

<pallas_src>
import functools

import jax
import jax.numpy as jnp
from jax.experimental import pallas as pl
from jax.experimental.pallas import tpu as pltpu

_LANE = 128


def _round_up(x, m):
    return ((x + m - 1) // m) * m


def _sublane_tile(dtype) -> int:
    """Minimum sublane multiple for the given dtype (f32: 8, bf16: 16, int8/fp8: 32)."""
    itemsize = jnp.dtype(dtype).itemsize
    return {4: 8, 2: 16, 1: 32}.get(itemsize, 8)


def _tpu_limits():
    """(physical VMEM bytes per TensorCore, TensorCores per chip), with safe fallbacks."""
    vmem_bytes = 128 * 1024 * 1024
    num_tc = 1
    try:
        info = pltpu.get_tpu_info()
        vmem_bytes = int(getattr(info, "vmem_capacity_bytes", vmem_bytes))
    except Exception:
        pass  # interpret mode / no hardware query available
    try:
        kind = jax.devices()[0].device_kind.lower()
        if "v7" in kind or "tpu7" in kind:
            num_tc = 2
            vmem_bytes = min(vmem_bytes, 64 * 1024 * 1024)  # 64 MiB per TC on v7x
    except Exception:
        pass
    return vmem_bytes, num_tc


def _linear_kernel(x_ref, w_ref, o_ref, *, compute_dtype):
    # x_ref: (tm, D) row tile, w_ref: (D, Cpad) resident transposed weight,
    # o_ref: (tm, Cpad) lane-dense output tile.  One MXU matmul per grid step.
    x = x_ref[...]
    w = w_ref[...]
    if compute_dtype is not None:
        x = x.astype(compute_dtype)
        w = w.astype(compute_dtype)
    o_ref[...] = jnp.dot(x, w, preferred_element_type=jnp.float32).astype(o_ref.dtype)


def prepare_classifier_weight(weight):
    """Hoisted (once-per-parameter) prep: transpose + lane-pad the nn.Linear weight.

    weight: [num_classes, embed_dim] (PyTorch nn.Linear layout)
    returns (w_t_padded [embed_dim, c_pad], num_classes)
    """
    num_classes, embed_dim = weight.shape
    del embed_dim
    c_pad = _round_up(num_classes, _LANE)
    w_t = weight.T  # [embed_dim, num_classes]
    if c_pad != num_classes:
        w_t = jnp.pad(w_t, ((0, 0), (0, c_pad - num_classes)))
    return w_t, num_classes


def classifier_apply(x, w_t, num_classes, *, tm=1024, auto_bf16=True):
    """y = x @ W.T using a pre-prepared (transposed, lane-padded) weight."""
    embed_dim, c_pad = w_t.shape
    assert x.shape[-1] == embed_dim
    assert c_pad % _LANE == 0

    lead_shape = x.shape[:-1]
    x2d = x.reshape(-1, embed_dim)
    M = x2d.shape[0]

    itemsize = x2d.dtype.itemsize
    sublane = _sublane_tile(x2d.dtype)
    tm = max(sublane, (int(tm) // sublane) * sublane)

    vmem_bytes, num_tc = _tpu_limits()
    vmem_budget = int(vmem_bytes * 0.7)  # ~45 MiB on v7x, ~90 MiB on v5e/v6e

    # Per-grid-step working set: single-buffered resident weight,
    # double-buffered x and out row tiles.
    w_bytes = embed_dim * c_pad * w_t.dtype.itemsize
    row_bytes = 2 * (embed_dim + c_pad) * itemsize
    tm_fit = max(vmem_budget - w_bytes, row_bytes * sublane) // row_bytes
    tm_fit = max(sublane, (tm_fit // sublane) * sublane)

    m_rounded = _round_up(M, sublane)
    tm_eff = min(tm, tm_fit, m_rounded)

    # v7x: make sure the grid has >= num_tc steps so "parallel" can shard
    # across both TensorCores (no effect on 1-TC v5e/v6e).
    if num_tc > 1 and M >= 256:
        per_core = _round_up(pl.cdiv(M, num_tc), sublane)
        tm_eff = min(tm_eff, per_core)
    tm_eff = max(sublane, (tm_eff // sublane) * sublane)

    grid_m = pl.cdiv(M, tm_eff)

    # In the compute-bound regime (large class count, f32 inputs) run the MXU
    # in bf16 with f32 accumulation.
    compute_dtype = None
    if auto_bf16 and x2d.dtype == jnp.float32 and num_classes >= 512:
        compute_dtype = jnp.bfloat16

    flops = 2 * M * embed_dim * num_classes
    bytes_accessed = (
        x2d.size * itemsize
        + w_t.size * w_t.dtype.itemsize
        + M * c_pad * itemsize
    )

    kernel = functools.partial(_linear_kernel, compute_dtype=compute_dtype)
    compiler_params = pltpu.CompilerParams(
        dimension_semantics=("parallel",),
        vmem_limit_bytes=int(vmem_bytes * 0.8),
    )
    cost = pl.CostEstimate(
        flops=flops, transcendentals=0, bytes_accessed=bytes_accessed
    )

    def _run(single_buffer_weight):
        if single_buffer_weight:
            w_spec = pl.BlockSpec(
                (embed_dim, c_pad), lambda i: (0, 0), pipeline_mode=pl.Buffered(1)
            )
        else:
            w_spec = pl.BlockSpec((embed_dim, c_pad), lambda i: (0, 0))
        return pl.pallas_call(
            kernel,
            out_shape=jax.ShapeDtypeStruct((M, c_pad), x2d.dtype),
            grid_spec=pltpu.PrefetchScalarGridSpec(
                num_scalar_prefetch=0,
                grid=(grid_m,),
                in_specs=[
                    pl.BlockSpec((tm_eff, embed_dim), lambda i: (i, 0)),
                    w_spec,
                ],
                out_specs=pl.BlockSpec((tm_eff, c_pad), lambda i: (i, 0)),
            ),
            compiler_params=compiler_params,
            cost_estimate=cost,
        )(x2d, w_t)

    try:
        out = _run(True)
    except Exception:
        # TODO(synk): pipeline_mode=pl.Buffered(1) unsupported on this jax
        #             version; fall back to default double-buffered weight.
        out = _run(False)

    if c_pad != num_classes:
        out = out[:, :num_classes]
    return out.reshape(*lead_shape, num_classes)


def peg_attentive_classifier(x, weight, *, tm=1024, auto_bf16=True):
    """One-shot convenience API (prepares the weight inline).

    x:      float array [..., embed_dim]
    weight: float array [num_classes, embed_dim]   (PyTorch nn.Linear layout)
    returns float array [..., num_classes]
    """
    w_t, num_classes = prepare_classifier_weight(weight)
    return classifier_apply(x, w_t, num_classes, tm=tm, auto_bf16=auto_bf16)


class PegAttentiveClassifier:
    """Forward-pass-only port of the PyTorch module.

    Weight transpose + lane padding is done ONCE at construction (hoisted out
    of the per-call hot path, per the perf review).
    """

    def __init__(self, weight, *, tm=1024, auto_bf16=True):
        self.w_t, self.num_classes = prepare_classifier_weight(weight)
        self.tm = tm
        self.auto_bf16 = auto_bf16

    def __call__(self, x):
        return classifier_apply(
            x, self.w_t, self.num_classes, tm=self.tm, auto_bf16=self.auto_bf16
        )


if __name__ == "__main__":
    key = jax.random.PRNGKey(0)
    kx, kw, kx2, kw2 = jax.random.split(key, 4)

    # Case 1: tiny M -> single-block kernel; padded (16 -> 128) output lanes.
    batch, seq, embed_dim, num_classes = 2, 8, 32, 16
    x = jax.random.normal(kx, (batch, seq, embed_dim), dtype=jnp.float32)
    weight = jax.random.normal(kw, (num_classes, embed_dim), dtype=jnp.float32) * 0.02

    y = jax.block_until_ready(peg_attentive_classifier(x, weight))
    y_ref = x @ weight.T
    assert y.shape == (batch, seq, num_classes)
    assert jnp.allclose(y, y_ref, atol=1e-5, rtol=1e-5)

    # Case 2: multi-step grid with a ragged final block (M=74, tm=32 -> grid=3)
    # via the hoisted-weight class wrapper.
    clf = PegAttentiveClassifier(weight, tm=32)
    x2 = jax.random.normal(kx2, (2, 37, embed_dim), dtype=jnp.float32)
    y2 = jax.block_until_ready(clf(x2))
    assert y2.shape == (2, 37, num_classes)
    assert jnp.allclose(y2, x2 @ weight.T, atol=1e-5, rtol=1e-5)

    # Case 3: lane-aligned class count (128) -> no pad, no post-call slice.
    nc3 = 128
    w3 = jax.random.normal(kw2, (nc3, embed_dim), dtype=jnp.float32) * 0.02
    y3 = jax.block_until_ready(peg_attentive_classifier(x, w3))
    assert y3.shape == (batch, seq, nc3)
    assert jnp.allclose(y3, x @ w3.T, atol=1e-5, rtol=1e-5)

    print("KERNEL_OK")
</pallas_src>

<mosaic_0001>
module attributes {stable_mosaic.version = 11 : i64} {
  func.func @_linear_kernel(%arg0: i32, %arg1: memref<16x32xf32, #tpu.memory_space<vmem>>, %arg2: memref<32x128xf32, #tpu.memory_space<vmem>>, %arg3: memref<16x128xf32, #tpu.memory_space<vmem>>) attributes {dimension_semantics = [#tpu.dimension_semantics<parallel>], iteration_bounds = array<i64: 1>, scalar_prefetch = 0 : i64, scratch_operands = 0 : i64, tpu.core_type = #tpu.core_type<tc>, window_params = [{transform_indices = @transform_0, window_bounds = array<i64: 16, 32>}, {pipeline_mode = #tpu.pipeline_mode<synchronous>, transform_indices = @transform_1, window_bounds = array<i64: 32, 128>}, {transform_indices = @transform_2, window_bounds = array<i64: 16, 128>}]} {
    %c0 = arith.constant 0 : index
    %c0_0 = arith.constant 0 : index
    %0 = vector.load %arg1[%c0, %c0_0] : memref<16x32xf32, #tpu.memory_space<vmem>>, vector<16x32xf32>
    %c0_1 = arith.constant 0 : index
    %c0_2 = arith.constant 0 : index
    %1 = vector.load %arg2[%c0_1, %c0_2] : memref<32x128xf32, #tpu.memory_space<vmem>>, vector<32x128xf32>
    %cst = arith.constant dense<0.000000e+00> : vector<16x128xf32>
    %2 = tpu.matmul %0, %1, %cst {dimension_numbers = #tpu.dot_dimension_numbers<[1], [0], [0], [1], [0, 0, 1, 1], [], []>} : vector<16x32xf32>, vector<32x128xf32>, vector<16x128xf32> -> vector<16x128xf32>
    %c0_3 = arith.constant 0 : index
    %c0_4 = arith.constant 0 : index
    %3 = vector.load %arg3[%c0_3, %c0_4] : memref<16x128xf32, #tpu.memory_space<vmem>>, vector<16x128xf32>
    tpu.vector_store %arg3[%c0_3, %c0_4], %2 {strides = array<i32>} : memref<16x128xf32, #tpu.memory_space<vmem>>, vector<16x128xf32>,
    return
  }
  func.func @transform_0(%arg0: i32) -> (i32, i32) {
    %c0_i32 = arith.constant 0 : i32
    %c0_i32_0 = arith.constant 0 : i32
    return %arg0, %c0_i32 : i32, i32
  }
  func.func @transform_1(%arg0: i32) -> (i32, i32) {
    %c0_i32 = arith.constant 0 : i32
    %c0_i32_0 = arith.constant 0 : i32
    %c0_i32_1 = arith.constant 0 : i32
    return %c0_i32, %c0_i32_0 : i32, i32
  }
  func.func @transform_2(%arg0: i32) -> (i32, i32) {
    %c0_i32 = arith.constant 0 : i32
    %c0_i32_0 = arith.constant 0 : i32
    return %arg0, %c0_i32 : i32, i32
  }
}

module attributes {stable_mosaic.version = 11 : i64} {
  func.func @_linear_kernel(%arg0: i32, %arg1: memref<16x32xf32, #tpu.memory_space<vmem>>, %arg2: memref<32x128xf32, #tpu.memory_space<vmem>>, %arg3: memref<16x128xf32, #tpu.memory_space<vmem>>) attributes {dimension_semantics = [#tpu.dimension_semantics<parallel>], iteration_bounds = array<i64: 1>, scalar_prefetch = 0 : i64, scratch_operands = 0 : i64, tpu.core_type = #tpu.core_type<tc>, window_params = [{transform_indices = @transform_0, window_bounds = array<i64: 16, 32>}, {pipeline_mode = #tpu.pipeline_mode<synchronous>, transform_indices = @transform_1, window_bounds = array<i64: 32, 128>}, {transform_indices = @transform_2, window_bounds = array<i64: 16, 128>}]} {
    %c0 = arith.constant 0 : index
    %c0_0 = arith.constant 0 : index
    %0 = vector.load %arg1[%c0, %c0_0] : memref<16x32xf32, #tpu.memory_space<vmem>>, vector<16x32xf32>
    %c0_1 = arith.constant 0 : index
    %c0_2 = arith.constant 0 : index
    %1 = vector.load %arg2[%c0_1, %c0_2] : memref<32x128xf32, #tpu.memory_space<vmem>>, vector<32x128xf32>
    %cst = arith.constant dense<0.000000e+00> : vector<16x128xf32>
    %2 = tpu.matmul %0, %1, %cst {dimension_numbers = #tpu.dot_dimension_numbers<[1], [0], [0], [1], [0, 0, 1, 1], [], []>} : vector<16x32xf32>, vector<32x128xf32>, vector<16x128xf32> -> vector<16x128xf32>
    %c0_3 = arith.constant 0 : index
    %c0_4 = arith.constant 0 : index
    %3 = vector.load %arg3[%c0_3, %c0_4] : memref<16x128xf32, #tpu.memory_space<vmem>>, vector<16x128xf32>
    tpu.vector_store %arg3[%c0_3, %c0_4], %2 {strides = array<i32>} : memref<16x128xf32, #tpu.memory_space<vmem>>, vector<16x128xf32>,
    return
  }
  func.func @transform_0(%arg0: i32) -> (i32, i32) {
    %c0_i32 = arith.constant 0 : i32
    %c0_i32_0 = arith.constant 0 : i32
    return %arg0, %c0_i32 : i32, i32
  }
  func.func @transform_1(%arg0: i32) -> (i32, i32) {
    %c0_i32 = arith.constant 0 : i32
    %c0_i32_0 = arith.constant 0 : i32
    %c0_i32_1 = arith.constant 0 : i32
    return %c0_i32, %c0_i32_0 : i32, i32
  }
  func.func @transform_2(%arg0: i32) -> (i32, i32) {
    %c0_i32 = arith.constant 0 : i32
    %c0_i32_0 = arith.constant 0 : i32
    return %arg0, %c0_i32 : i32, i32
  }
}

</mosaic_0001>

<bundles_post_ra>
// kernel: tpu_custom_call.1
= control target key start
LH: loop header
LB: loop body
LE: loop exit
PB: predicated region body
PF: predicated region fallthrough
CT: control target
= control target key end

     0   :  { %7 = vsyncpa [#allocation3], 0  ;;  %s278_s0 = inlined_call_operand.hbm [shape: f32[16,32], index: 0, kind: input, shape index: {}]   ;;  %s279_s1 = inlined_call_operand.hbm [shape: f32[32,128], index: 1, kind: input, shape index: {}]   ;;  %s280_s2 = inlined_call_operand.hbm [shape: f32[16,128], index: 2, kind: output, shape index: {}]  }
   0x1   :  { %8 = vsyncpa [#allocation6], 0 }
   0x2   :  { %9 = vsyncpa [#allocation4], 0  ;;  %s238_s9 = smov [#allocation2]  }
   0x3   :  { %s15_s10 = sshll.u32 %s238_s9, 4  ;;  %s16_s10 = int_to_ptr.vmem [resolvable:$true] %s15_s10 }
   0x4   :  { %s180_s11 = scalar_lea.vmem %s16_s10, 256  ;;  %p185_p1 = scmp.lt.s32.totalorder %s16_s10, %s16_s10 }
   0x5   :  { %p181_p0 = scmp.ne.s32.totalorder %s16_s10, %s180_s11  ;;  %p186_p2 = scmp.lt.s32.totalorder %s180_s11, %s180_s11 }
   0x7   :  { %p187_p3 = por %p186_p2, %p185_p1 }
   0x9   :  { %p188_p4 = pnand %p187_p3, %p181_p0 }
   0xb   :  { %191 = shalt.err (!%p188_p4)
}
   0xc   :  { %s239_s12 = smov 128   ;;  %s240_s13 = smov 8  }
   0xd   :  { %21 = dma.hbm_to_vmem [thread:$0]  %s278_s0, 256, %s16_s10, [#allocation3], %s239_s12, %s239_s12, %s240_s13  }
   0xe   :  { %s241_s16 = smov [#allocation5]  }
   0xf   :  { %s27_s17 = sshll.u32 %s241_s16, 4  ;;  %s28_s17 = int_to_ptr.vmem [resolvable:$true] %s27_s17 }
  0x10   :  { %s200_s18 = scalar_lea.vmem %s28_s17, 512  ;;  %p205_p6 = scmp.lt.s32.totalorder %s28_s17, %s28_s17 }
  0x11   :  { %p201_p5 = scmp.ne.s32.totalorder %s28_s17, %s200_s18  ;;  %p206_p7 = scmp.lt.s32.totalorder %s200_s18, %s200_s18 }
  0x13   :  { %p207_p8 = por %p206_p7, %p205_p6 }
  0x15   :  { %p208_p9 = pnand %p207_p8, %p201_p5 }
  0x17   :  { %211 = shalt.err (!%p208_p9)
}
  0x18   :  { %33 = dma.hbm_to_vmem [thread:$0]  %s279_s1, 512, %s28_s17, [#allocation6], %s239_s12, %s239_s12, %s240_s13  }
  0x19   :  { %232 = dma.done.wait [#allocation3], 256  }
  0x1a   :  { %233 = vsyncadd [#allocation3], 4294967040 }
  0x1b   :  { %234 = dma.done.wait [#allocation6], 512  }
  0x1c   :  { %235 = vsyncadd [#allocation6], 4294966784  ;;  %vm46_vm0 = vcmask 261120   ;;  %v45_v0 = vld [vmem:[#allocation5 + $0x18] sm:$0xff]  ;;  %v44_v1 = vld [vmem:[#allocation5 + $0x10] sm:$0xff]  ;;  %s242_s0 = smov [#allocation7]  }
  0x1d   :  { %156 = vmatprep.subr.mxu0 %v45_v0  ;;  %v40_v2 = vld [vmem:[#allocation2] sm:$0xff]  ;;  %v43_v3 = vld [vmem:[#allocation5 + $0x8] sm:$0xff]  ;;  %v42_v4 = vld [vmem:[#allocation5] sm:$0xff]  ;;  %s135_s1 = sshll.u32 %s242_s0, 4  ;;  %s136_s1 = int_to_ptr.vmem [resolvable:$true] %s135_s1 }
  0x1e   :  { %157 = vmatpush3.msra.mxu0 %v45_v0  ;;  %164 = vmatprep.mubr.msk.f32.mxu0 %vm46_vm0, %v40_v2  ;;  %v41_v5 = vld [vmem:[#allocation2 + $0x8] sm:$0xff]  ;;  %s212_s21 = scalar_lea.vmem %s136_s1, 256  ;;  %p217_p11 = scmp.lt.s32.totalorder %s136_s1, %s136_s1 }
  0x1f   :  { %158 = vmatprep.subr.mxu0 %v44_v1  ;;  %p213_p10 = scmp.ne.s32.totalorder %s136_s1, %s212_s21  ;;  %p218_p12 = scmp.lt.s32.totalorder %s212_s21, %s212_s21 }
  0x20   :  { %159 = vmatpush3.msra.mxu0 %v44_v1 }
  0x21   :  { %160 = vmatprep.subr.mxu0 %v43_v3  ;;  %p219_p13 = por %p218_p12, %p217_p11 }
  0x22   :  { %161 = vmatpush3.msra.mxu0 %v43_v3 }
  0x23   :  { %162 = vmatprep.subr.mxu0 %v42_v4  ;;  %p220_p0 = pnand %p219_p13, %p213_p10 }
  0x24   :  { %163 = vmatpush3.msra.mxu0 %v42_v4 }
  0x25   :  { %165 = vmatmul.mubr.msk.f32.vlgmr.msra.gmra.mxu0 %vm46_vm0, %v41_v5 }
  0xe5   :  { %v166_v6 = vpop.f32.mrf.mxu0 }
  0xe6   :  { %129 = vst [vmem:[#allocation7 + $0x8] sm:$0xff] %v166_v6 }
  0xe7   :  { %v119_v7 = vpop.f32.mrf.mxu0 }
  0xe8   :  { %128 = vst [vmem:[#allocation7] sm:$0xff] %v119_v7 }
  0xe9   :  { %223 = shalt.err (!%p220_p0)
}
  0xea   :  { %141 = dma.vmem_to_hbm [thread:$0]  %s136_s1, 256, %s280_s2, [#allocation4], %s239_s12, %s239_s12, %s240_s13  }
  0xeb   :  { %236 = dma.done.wait [#allocation4], 256  }
  0xec   :  { %237 = vsyncadd [#allocation4], 4294967040 }
  0xed   :  { %145 = vsyncpa [#allocation3], 1 }
  0xee   :  { %146 = vsyncpa [#allocation6], 1 }
  0xef   :  { %147 = vsyncpa [#allocation4], 1 }

// kernel: tpu_custom_call.1
= control target key start
LH: loop header
LB: loop body
LE: loop exit
PB: predicated region body
PF: predicated region fallthrough
CT: control target
= control target key end

     0   :  { %7 = vsyncpa [#allocation3], 0  ;;  %s278_s0 = inlined_call_operand.hbm [shape: f32[16,32], index: 0, kind: input, shape index: {}]   ;;  %s279_s1 = inlined_call_operand.hbm [shape: f32[32,128], index: 1, kind: input, shape index: {}]   ;;  %s280_s2 = inlined_call_operand.hbm [shape: f32[16,128], index: 2, kind: output, shape index: {}]  }
   0x1   :  { %8 = vsyncpa [#allocation6], 0 }
   0x2   :  { %9 = vsyncpa [#allocation4], 0  ;;  %s238_s9 = smov [#allocation2]  }
   0x3   :  { %s15_s10 = sshll.u32 %s238_s9, 4  ;;  %s16_s10 = int_to_ptr.vmem [resolvable:$true] %s15_s10 }
   0x4   :  { %s180_s11 = scalar_lea.vmem %s16_s10, 256  ;;  %p185_p1 = scmp.lt.s32.totalorder %s16_s10, %s16_s10 }
   0x5   :  { %p181_p0 = scmp.ne.s32.totalorder %s16_s10, %s180_s11  ;;  %p186_p2 = scmp.lt.s32.totalorder %s180_s11, %s180_s11 }
   0x7   :  { %p187_p3 = por %p186_p2, %p185_p1 }
   0x9   :  { %p188_p4 = pnand %p187_p3, %p181_p0 }
   0xb   :  { %191 = shalt.err (!%p188_p4)
}
   0xc   :  { %s239_s12 = smov 128   ;;  %s240_s13 = smov 8  }
   0xd   :  { %21 = dma.hbm_to_vmem [thread:$0]  %s278_s0, 256, %s16_s10, [#allocation3], %s239_s12, %s239_s12, %s240_s13  }
   0xe   :  { %s241_s16 = smov [#allocation5]  }
   0xf   :  { %s27_s17 = sshll.u32 %s241_s16, 4  ;;  %s28_s17 = int_to_ptr.vmem [resolvable:$true] %s27_s17 }
  0x10   :  { %s200_s18 = scalar_lea.vmem %s28_s17, 512  ;;  %p205_p6 = scmp.lt.s32.totalorder %s28_s17, %s28_s17 }
  0x11   :  { %p201_p5 = scmp.ne.s32.totalorder %s28_s17, %s200_s18  ;;  %p206_p7 = scmp.lt.s32.totalorder %s200_s18, %s200_s18 }
  0x13   :  { %p207_p8 = por %p206_p7, %p205_p6 }
  0x15   :  { %p208_p9 = pnand %p207_p8, %p201_p5 }
  0x17   :  { %211 = shalt.err (!%p208_p9)
}
  0x18   :  { %33 = dma.hbm_to_vmem [thread:$0]  %s279_s1, 512, %s28_s17, [#allocation6], %s239_s12, %s239_s12, %s240_s13  }
  0x19   :  { %232 = dma.done.wait [#allocation3], 256  }
  0x1a   :  { %233 = vsyncadd [#allocation3], 4294967040 }
  0x1b   :  { %234 = dma.done.wait [#allocation6], 512  }
  0x1c   :  { %235 = vsyncadd [#allocation6], 4294966784  ;;  %vm46_vm0 = vcmask 261120   ;;  %v45_v0 = vld [vmem:[#allocation5 + $0x18] sm:$0xff]  ;;  %v44_v1 = vld [vmem:[#allocation5 + $0x10] sm:$0xff]  ;;  %s242_s0 = smov [#allocation7]  }
  0x1d   :  { %156 = vmatprep.subr.mxu0 %v45_v0  ;;  %v40_v2 = vld [vmem:[#allocation2] sm:$0xff]  ;;  %v43_v3 = vld [vmem:[#allocation5 + $0x8] sm:$0xff]  ;;  %v42_v4 = vld [vmem:[#allocation5] sm:$0xff]  ;;  %s135_s1 = sshll.u32 %s242_s0, 4  ;;  %s136_s1 = int_to_ptr.vmem [resolvable:$true] %s135_s1 }
  0x1e   :  { %157 = vmatpush3.msra.mxu0 %v45_v0  ;;  %164 = vmatprep.mubr.msk.f32.mxu0 %vm46_vm0, %v40_v2  ;;  %v41_v5 = vld [vmem:[#allocation2 + $0x8] sm:$0xff]  ;;  %s212_s21 = scalar_lea.vmem %s136_s1, 256  ;;  %p217_p11 = scmp.lt.s32.totalorder %s136_s1, %s136_s1 }
  0x1f   :  { %158 = vmatprep.subr.mxu0 %v44_v1  ;;  %p213_p10 = scmp.ne.s32.totalorder %s136_s1, %s212_s21  ;;  %p218_p12 = scmp.lt.s32.totalorder %s212_s21, %s212_s21 }
  0x20   :  { %159 = vmatpush3.msra.mxu0 %v44_v1 }
  0x21   :  { %160 = vmatprep.subr.mxu0 %v43_v3  ;;  %p219_p13 = por %p218_p12, %p217_p11 }
  0x22   :  { %161 = vmatpush3.msra.mxu0 %v43_v3 }
  0x23   :  { %162 = vmatprep.subr.mxu0 %v42_v4  ;;  %p220_p0 = pnand %p219_p13, %p213_p10 }
  0x24   :  { %163 = vmatpush3.msra.mxu0 %v42_v4 }
  0x25   :  { %165 = vmatmul.mubr.msk.f32.vlgmr.msra.gmra.mxu0 %vm46_vm0, %v41_v5 }
  0xe5   :  { %v166_v6 = vpop.f32.mrf.mxu0 }
  0xe6   :  { %129 = vst [vmem:[#allocation7 + $0x8] sm:$0xff] %v166_v6 }
  0xe7   :  { %v119_v7 = vpop.f32.mrf.mxu0 }
  0xe8   :  { %128 = vst [vmem:[#allocation7] sm:$0xff] %v119_v7 }
  0xe9   :  { %223 = shalt.err (!%p220_p0)
}
  0xea   :  { %141 = dma.vmem_to_hbm [thread:$0]  %s136_s1, 256, %s280_s2, [#allocation4], %s239_s12, %s239_s12, %s240_s13  }
  0xeb   :  { %236 = dma.done.wait [#allocation4], 256  }
  0xec   :  { %237 = vsyncadd [#allocation4], 4294967040 }
  0xed   :  { %145 = vsyncpa [#allocation3], 1 }
  0xee   :  { %146 = vsyncpa [#allocation6], 1 }
  0xef   :  { %147 = vsyncpa [#allocation4], 1 }

</bundles_post_ra>
